<compile_context>
chip_gen: v6e
topology: v6e:2x2x1
jax: 0.10.0
libtpu: 0.0.40
codegen_flags: <defaults>
</compile_context>

<pallas_src>
import functools

import jax
import jax.numpy as jnp
from jax.experimental import pallas as pl
from jax.experimental.pallas import tpu as pltpu

LANE = 128


# ----------------------------- in-kernel helpers ----------------------------

def _conv3x3_rolls(xb, w9_ref, mask_ref, shifts):
    """Stride-1 3x3 conv on a flattened-per-image (Ci, TM) bf16 tile.

    Tap t (dh, dw) needs input pixel q + s_t (s_t = dh*W + dw) in the flat
    layout; `shifts[t]` is the pre-computed (-s_t) % TM so that
        shifted[:, q] = xb[:, (q + s_t) % TM].
    The shift is done with two static lane slices + a lane concat (unambiguous
    semantics, VMEM-local).  mask_ref[t] zeroes every output pixel whose
    tap-neighbour falls outside its own image (handles image edges, the
    per-image lane padding and tile wrap-around in one go).
    Returns the f32 (Co, TM) pre-activation accumulator.
    """
    tm = xb.shape[-1]
    acc = None
    for t, sh in enumerate(shifts):
        if sh == 0:
            xt = xb
        else:
            xt = jnp.concatenate([xb[:, tm - sh:], xb[:, :tm - sh]], axis=1)
        xt = xt * mask_ref[t]                      # (1, TM) bf16 broadcast
        c = jnp.dot(w9_ref[t], xt, preferred_element_type=jnp.float32)
        acc = c if acc is None else acc + c
    return acc


def _elu(z):
    # ELU(alpha=1); clamp the exp argument so the discarded branch never infs.
    return jnp.where(z > 0.0, z, jnp.exp(jnp.minimum(z, 0.0)) - 1.0)


# --------------------------------- kernels ----------------------------------

def _block_same_kernel(x_ref, w1_ref, s1_ref, w2_ref, s2_ref, mask_ref, out_ref,
                       *, shifts, mxu_dtype):
    """same=True:  ELU( ReLU(BN2(conv2( ReLU(BN1(conv1(x))) ))) + x )."""
    x = x_ref[...]                                   # (Cin, TM) f32
    xb = x.astype(mxu_dtype)                         # bf16 MXU operand
    y1 = jnp.maximum(_conv3x3_rolls(xb, w1_ref, mask_ref, shifts) + s1_ref[...], 0.0)
    y1b = y1.astype(mxu_dtype)
    y2 = jnp.maximum(_conv3x3_rolls(y1b, w2_ref, mask_ref, shifts) + s2_ref[...], 0.0)
    z = y2 + x                                       # identity residual in f32
    out_ref[...] = _elu(z)


def _block_down_kernel(p_ref, w1r_ref, s1r_ref, w2_ref, s2_ref, mask_ref, out_ref,
                       *, shifts, cout, mxu_dtype):
    """same=False: conv1(s=2) and the conv+BN residual share one patch matmul;
    conv2 + ReLU + residual add + ELU run on the result without leaving VMEM."""
    p = p_ref[...]                                   # (9*Cin, TM) bf16 patches
    a = jnp.dot(w1r_ref[...], p, preferred_element_type=jnp.float32) + s1r_ref[...]
    y1 = jnp.maximum(a[:cout], 0.0)                  # conv1 -> BN1 -> ReLU
    res = a[cout:]                                   # residual conv -> BN
    y1b = y1.astype(mxu_dtype)
    y2 = jnp.maximum(_conv3x3_rolls(y1b, w2_ref, mask_ref, shifts) + s2_ref[...], 0.0)
    out_ref[...] = _elu(y2 + res)


# ------------------------------- glue (JAX) ----------------------------------

def _plan(n_imgs, s_img, rows_in, cout):
    """Images-per-tile (largest that fits a VMEM budget) + vmem limit."""
    try:
        cap = int(pltpu.get_tpu_info().vmem_capacity_bytes)
        if cap <= 0:
            cap = 64 << 20
    except Exception:
        cap = 64 << 20                               # v7x floor; v5e/v6e = 128 MiB
    # rough VMEM bytes per pixel column: double-buffered input + output rows,
    # masks, f32 intermediates (acc / y1 / res / z) and shifted bf16 temporaries.
    per_px = 14 * rows_in + 28 * cout + 40
    budget = cap // 2
    g = max(1, min(n_imgs, budget // max(1, per_px * s_img)))
    g = min(g, max(1, 8192 // s_img))                # keep tiles <= 8192 lanes
    n_tiles = -(-n_imgs // g)
    vlim = int(min(max(2 * per_px * s_img * g + (8 << 20), 32 << 20),
                   cap - (4 << 20)))
    return g, n_tiles, vlim


def _to_flat(feat, n, n_pad, s_img, hw, dtype):
    """(C, N, hw) -> (C, n_pad*s_img), zero-padding each image to s_img columns."""
    c = feat.shape[0]
    if n_pad == n and s_img == hw:
        out = feat.reshape(c, n * hw)
    else:
        out = jnp.zeros((c, n_pad, s_img), feat.dtype)
        out = out.at[:, :n, :hw].set(feat)
        out = out.reshape(c, n_pad * s_img)
    return out.astype(dtype)


def _tap_masks(ho, wo, s_img, g, dtype):
    """(9, 1, g*s_img) 0/1 masks: tap (dh,dw) is valid at flattened pixel q."""
    ii = jnp.arange(ho).reshape(ho, 1)
    jj = jnp.arange(wo).reshape(1, wo)
    rows = []
    for dh in (-1, 0, 1):
        for dw in (-1, 0, 1):
            ok = ((ii + dh >= 0) & (ii + dh < ho) &
                  (jj + dw >= 0) & (jj + dw < wo))
            m = jnp.zeros((s_img,), dtype).at[:ho * wo].set(
                ok.reshape(-1).astype(dtype))
            rows.append(m)
    m9 = jnp.stack(rows)                              # (9, s_img)
    return jnp.tile(m9, (1, g)).reshape(9, 1, g * s_img)


def _extract_patches_s2(x_cnhw, stride):
    """Valid (pad=0) 3x3 patches at `stride`: (C,N,H,W) -> (9C, N, Ho*Wo)."""
    c, n, h, w = x_cnhw.shape
    ho = (h - 3) // stride + 1
    wo = (w - 3) // stride + 1
    planes = []
    for kh in range(3):
        for kw in range(3):
            v = x_cnhw[:, :, kh:kh + (ho - 1) * stride + 1:stride,
                             kw:kw + (wo - 1) * stride + 1:stride]
            planes.append(v.reshape(c, n, ho * wo))
    return jnp.concatenate(planes, axis=0), ho, wo


def _flat_w(w9):
    """(9, Co, Ci) -> (Co, 9*Ci) with K index = tap*Ci + c (patch-matrix order)."""
    t, co, ci = w9.shape
    return jnp.transpose(w9, (1, 0, 2)).reshape(co, t * ci)


def block_forward(x_nchw, params, *, same, stride=2, mxu_dtype=jnp.bfloat16):
    """Full Block forward.  Input/output are NCHW like the PyTorch module."""
    n, cin, h, w = x_nchw.shape
    cout = params["shift1"].shape[0]
    xc = jnp.transpose(x_nchw.astype(jnp.float32), (1, 0, 2, 3))   # (Cin, N, H, W)

    if same:
        assert cin == cout, "same=True requires in_channels == out_channels"
        ho, wo = h, w
        feat = xc.reshape(cin, n, h * w)             # f32 (residual stays exact)
        feat_dtype, rows_in = jnp.float32, cin
    else:
        feat, ho, wo = _extract_patches_s2(xc, stride)   # (9*Cin, N, Ho*Wo)
        feat_dtype, rows_in = mxu_dtype, 9 * cin

    hw = ho * wo
    s_img = LANE * (-(-hw // LANE))                  # lane-aligned pixels / image
    g, n_tiles, vlim = _plan(n, s_img, rows_in, cout)
    n_pad, tm, m_pad = g * n_tiles, g * s_img, g * n_tiles * s_img

    fp = _to_flat(feat, n, n_pad, s_img, hw, feat_dtype)     # (rows_in, m_pad)
    masks = _tap_masks(ho, wo, s_img, g, mxu_dtype)          # (9, 1, tm)
    shifts = tuple(int((-(dh * wo + dw)) % tm)
                   for dh in (-1, 0, 1) for dw in (-1, 0, 1))

    w2 = params["w2"].astype(mxu_dtype)
    s2 = params["shift2"]

    common = dict(
        out_shape=jax.ShapeDtypeStruct((cout, m_pad), jnp.float32),
        grid=(n_tiles,),
        out_specs=pl.BlockSpec((cout, tm), lambda i: (0, i)),
        compiler_params=pltpu.CompilerParams(
            dimension_semantics=("parallel",), vmem_limit_bytes=vlim),
    )

    if same:
        w1 = params["w1"].astype(mxu_dtype)
        flops = 2 * 9 * cout * (cin + cout) * m_pad
        bytes_accessed = (cin * m_pad * 4 + cout * m_pad * 4 + 9 * tm * 2
                          + 9 * cout * (cin + cout) * 2)
        out = pl.pallas_call(
            functools.partial(_block_same_kernel, shifts=shifts,
                              mxu_dtype=mxu_dtype),
            in_specs=[
                pl.BlockSpec((cin, tm), lambda i: (0, i)),
                pl.BlockSpec((9, cout, cin), lambda i: (0, 0, 0)),
                pl.BlockSpec((cout, 1), lambda i: (0, 0)),
                pl.BlockSpec((9, cout, cout), lambda i: (0, 0, 0)),
                pl.BlockSpec((cout, 1), lambda i: (0, 0)),
                pl.BlockSpec((9, 1, tm), lambda i: (0, 0, 0)),
            ],
            cost_estimate=pl.CostEstimate(flops=flops,
                                          transcendentals=cout * m_pad,
                                          bytes_accessed=bytes_accessed),
            **common,
        )(fp, w1, params["shift1"], w2, s2, masks)
    else:
        w1r = jnp.concatenate([_flat_w(params["w1"]), _flat_w(params["wr"])],
                              axis=0).astype(mxu_dtype)
        s1r = jnp.concatenate([params["shift1"], params["shift_r"]], axis=0)
        flops = 2 * (2 * cout) * (9 * cin) * m_pad + 2 * 9 * cout * cout * m_pad
        bytes_accessed = (9 * cin * m_pad * 2 + cout * m_pad * 4 + 9 * tm * 2
                          + 2 * cout * 9 * cin * 2 + 9 * cout * cout * 2)
        out = pl.pallas_call(
            functools.partial(_block_down_kernel, shifts=shifts, cout=cout,
                              mxu_dtype=mxu_dtype),
            in_specs=[
                pl.BlockSpec((9 * cin, tm), lambda i: (0, i)),
                pl.BlockSpec((2 * cout, 9 * cin), lambda i: (0, 0)),
                pl.BlockSpec((2 * cout, 1), lambda i: (0, 0)),
                pl.BlockSpec((9, cout, cout), lambda i: (0, 0, 0)),
                pl.BlockSpec((cout, 1), lambda i: (0, 0)),
                pl.BlockSpec((9, 1, tm), lambda i: (0, 0, 0)),
            ],
            cost_estimate=pl.CostEstimate(flops=flops,
                                          transcendentals=cout * m_pad,
                                          bytes_accessed=bytes_accessed),
            **common,
        )(fp, w1r, s1r, w2, s2, masks)

    out = out.reshape(cout, n_pad, s_img)[:, :n, :hw].reshape(cout, n, ho, wo)
    return jnp.transpose(out, (1, 0, 2, 3))                     # back to NCHW


# -------------------------- parameter construction ---------------------------

def init_block_params(key, cin, cout, same, eps=1e-5):
    """Random Conv/BN params with BN scale + conv bias folded into (w9, shift).

    w* layout: (9, Cout, Cin) with tap index = kh*3 + kw.  Inference-mode BN.
    """
    ks = jax.random.split(key, 18)

    def conv_w(k, ci, co):
        return 0.1 * jax.random.normal(k, (3, 3, ci, co), jnp.float32)   # HWIO

    def fold(keys, w_hwio):
        kg, kb, km, kv, kbias = keys
        co = w_hwio.shape[-1]
        gamma = 1.0 + 0.1 * jax.random.normal(kg, (co,), jnp.float32)
        beta = 0.1 * jax.random.normal(kb, (co,), jnp.float32)
        mean = 0.1 * jax.random.normal(km, (co,), jnp.float32)
        var = 1.0 + 0.1 * jax.random.uniform(kv, (co,), jnp.float32)
        bias = 0.1 * jax.random.normal(kbias, (co,), jnp.float32)        # conv bias
        scale = gamma / jnp.sqrt(var + eps)
        shift = beta + (bias - mean) * scale
        w9 = jnp.transpose(w_hwio * scale, (0, 1, 3, 2)).reshape(9, co, -1)
        return w9, shift.reshape(co, 1)

    params = {}
    params["w1"], params["shift1"] = fold(ks[2:7], conv_w(ks[0], cin, cout))
    params["w2"], params["shift2"] = fold(ks[7:12], conv_w(ks[1], cout, cout))
    if not same:
        params["wr"], params["shift_r"] = fold(ks[13:18], conv_w(ks[12], cin, cout))
    return params


# ------------------------ pure-JAX reference (check) -------------------------

def _ref_conv(x_nchw, w9, shift, stride, pad):
    t9, co, ci = w9.shape
    w_hwio = jnp.transpose(w9.reshape(3, 3, co, ci), (0, 1, 3, 2))
    y = jax.lax.conv_general_dilated(
        x_nchw, w_hwio, (stride, stride), [(pad, pad), (pad, pad)],
        dimension_numbers=("NCHW", "HWIO", "NCHW"),
        precision=jax.lax.Precision.HIGHEST)
    return y + shift.reshape(1, co, 1, 1)


def ref_block(x_nchw, params, *, same, stride=2):
    x = x_nchw.astype(jnp.float32)
    if same:
        res = x
        y = jnp.maximum(_ref_conv(x, params["w1"], params["shift1"], 1, 1), 0.0)
    else:
        res = _ref_conv(x, params["wr"], params["shift_r"], stride, 0)
        y = jnp.maximum(_ref_conv(x, params["w1"], params["shift1"], stride, 0), 0.0)
    y = jnp.maximum(_ref_conv(y, params["w2"], params["shift2"], 1, 1), 0.0)
    z = y + res
    return jnp.where(z > 0.0, z, jnp.exp(jnp.minimum(z, 0.0)) - 1.0)


# ----------------------------------- main ------------------------------------

if __name__ == "__main__":
    key = jax.random.PRNGKey(0)
    kx, kp1, kp2 = jax.random.split(key, 3)

    # NCHW input, like the PyTorch module.
    x = jax.random.normal(kx, (2, 4, 16, 16), jnp.float32)

    fwd = jax.jit(block_forward, static_argnames=("same", "stride", "mxu_dtype"))

    # Case 1: same=False  (downsampling: conv stride 2, conv+BN residual)
    p_down = init_block_params(kp1, cin=4, cout=8, same=False)
    out_down = jax.block_until_ready(fwd(x, p_down, same=False, stride=2))
    ref_down = ref_block(x, p_down, same=False, stride=2)
    assert out_down.shape == (2, 8, 7, 7), out_down.shape
    assert jnp.allclose(out_down, ref_down, rtol=2e-2, atol=2e-2), (
        "max|diff|=%f" % float(jnp.max(jnp.abs(out_down - ref_down))))

    # Case 2: same=True  (identity residual; in_channels == out_channels)
    p_same = init_block_params(kp2, cin=4, cout=4, same=True)
    out_same = jax.block_until_ready(fwd(x, p_same, same=True))
    ref_same = ref_block(x, p_same, same=True)
    assert out_same.shape == (2, 4, 16, 16), out_same.shape
    assert jnp.allclose(out_same, ref_same, rtol=2e-2, atol=2e-2), (
        "max|diff|=%f" % float(jnp.max(jnp.abs(out_same - ref_same))))

    print("KERNEL_OK")
</pallas_src>

<mosaic_0001>
module attributes {stable_mosaic.version = 11 : i64} {
  func.func @_block_down_kernel(%arg0: i32, %arg1: memref<36x256xbf16, #tpu.memory_space<vmem>>, %arg2: memref<16x36xbf16, #tpu.memory_space<vmem>>, %arg3: memref<16x1xf32, #tpu.memory_space<vmem>>, %arg4: memref<9x8x8xbf16, #tpu.memory_space<vmem>>, %arg5: memref<8x1xf32, #tpu.memory_space<vmem>>, %arg6: memref<9x1x256xbf16, #tpu.memory_space<vmem>>, %arg7: memref<8x256xf32, #tpu.memory_space<vmem>>) attributes {dimension_semantics = [#tpu.dimension_semantics<parallel>], iteration_bounds = array<i64: 1>, scalar_prefetch = 0 : i64, scratch_operands = 0 : i64, tpu.core_type = #tpu.core_type<tc>, window_params = [{transform_indices = @transform_0, window_bounds = array<i64: 36, 256>}, {pipeline_mode = #tpu.pipeline_mode<synchronous>, transform_indices = @transform_1, window_bounds = array<i64: 16, 36>}, {pipeline_mode = #tpu.pipeline_mode<synchronous>, transform_indices = @transform_2, window_bounds = array<i64: 16, 1>}, {pipeline_mode = #tpu.pipeline_mode<synchronous>, transform_indices = @transform_3, window_bounds = array<i64: 9, 8, 8>}, {pipeline_mode = #tpu.pipeline_mode<synchronous>, transform_indices = @transform_4, window_bounds = array<i64: 8, 1>}, {pipeline_mode = #tpu.pipeline_mode<synchronous>, transform_indices = @transform_5, window_bounds = array<i64: 9, 1, 256>}, {transform_indices = @transform_6, window_bounds = array<i64: 8, 256>}]} {
    %c0 = arith.constant 0 : index
    %c0_0 = arith.constant 0 : index
    %0 = vector.load %arg1[%c0, %c0_0] : memref<36x256xbf16, #tpu.memory_space<vmem>>, vector<36x256xbf16>
    %c0_1 = arith.constant 0 : index
    %c0_2 = arith.constant 0 : index
    %1 = vector.load %arg2[%c0_1, %c0_2] : memref<16x36xbf16, #tpu.memory_space<vmem>>, vector<16x36xbf16>
    %cst = arith.constant dense<0.000000e+00> : vector<16x256xf32>
    %2 = tpu.matmul %1, %0, %cst {dimension_numbers = #tpu.dot_dimension_numbers<[1], [0], [0], [1], [0, 0, 1, 1], [], []>} : vector<16x36xbf16>, vector<36x256xbf16>, vector<16x256xf32> -> vector<16x256xf32>
    %c0_3 = arith.constant 0 : index
    %c0_4 = arith.constant 0 : index
    %3 = vector.load %arg3[%c0_3, %c0_4] : memref<16x1xf32, #tpu.memory_space<vmem>>, vector<16x1xf32>
    %4 = vector.broadcast %3 : vector<16x1xf32> to vector<16x256xf32>
    %5 = arith.addf %2, %4 : vector<16x256xf32>
    %6 = vector.extract_strided_slice %5 {offsets = [0, 0], sizes = [8, 256], strides = [1, 1]} : vector<16x256xf32> to vector<8x256xf32>
    %cst_5 = arith.constant 0.000000e+00 : f32
    %7 = vector.broadcast %cst_5 : f32 to vector<8x256xf32>
    %8 = arith.maximumf %6, %7 : vector<8x256xf32>
    %9 = vector.extract_strided_slice %5 {offsets = [8, 0], sizes = [8, 256], strides = [1, 1]} : vector<16x256xf32> to vector<8x256xf32>
    %10 = arith.truncf %8 : vector<8x256xf32> to vector<8x256xbf16>
    %11 = vector.extract_strided_slice %10 {offsets = [0, 248], sizes = [8, 8], strides = [1, 1]} : vector<8x256xbf16> to vector<8x8xbf16>
    %12 = vector.extract_strided_slice %10 {offsets = [0, 0], sizes = [8, 248], strides = [1, 1]} : vector<8x256xbf16> to vector<8x248xbf16>
    %13 = tpu.concatenate %11, %12 in 1 : vector<8x8xbf16>, vector<8x248xbf16> -> vector<8x256xbf16>
    %c0_6 = arith.constant 0 : index
    %c0_7 = arith.constant 0 : index
    %c0_8 = arith.constant 0 : index
    %14 = vector.load %arg6[%c0_6, %c0_7, %c0_8] : memref<9x1x256xbf16, #tpu.memory_space<vmem>>, vector<1x1x256xbf16>
    %15 = vector.shape_cast %14 : vector<1x1x256xbf16> to vector<1x256xbf16>
    %16 = vector.broadcast %15 : vector<1x256xbf16> to vector<8x256xbf16>
    %17 = arith.mulf %13, %16 : vector<8x256xbf16>
    %c0_9 = arith.constant 0 : index
    %c0_10 = arith.constant 0 : index
    %c0_11 = arith.constant 0 : index
    %18 = vector.load %arg4[%c0_9, %c0_10, %c0_11] : memref<9x8x8xbf16, #tpu.memory_space<vmem>>, vector<1x8x8xbf16>
    %19 = vector.shape_cast %18 : vector<1x8x8xbf16> to vector<8x8xbf16>
    %cst_12 = arith.constant dense<0.000000e+00> : vector<8x256xf32>
    %20 = tpu.matmul %19, %17, %cst_12 {dimension_numbers = #tpu.dot_dimension_numbers<[1], [0], [0], [1], [0, 0, 1, 1], [], []>} : vector<8x8xbf16>, vector<8x256xbf16>, vector<8x256xf32> -> vector<8x256xf32>
    %21 = vector.extract_strided_slice %10 {offsets = [0, 249], sizes = [8, 7], strides = [1, 1]} : vector<8x256xbf16> to vector<8x7xbf16>
    %22 = vector.extract_strided_slice %10 {offsets = [0, 0], sizes = [8, 249], strides = [1, 1]} : vector<8x256xbf16> to vector<8x249xbf16>
    %23 = tpu.concatenate %21, %22 in 1 : vector<8x7xbf16>, vector<8x249xbf16> -> vector<8x256xbf16>
    %c1 = arith.constant 1 : index
    %c0_13 = arith.constant 0 : index
    %c0_14 = arith.constant 0 : index
    %24 = vector.load %arg6[%c1, %c0_13, %c0_14] : memref<9x1x256xbf16, #tpu.memory_space<vmem>>, vector<1x1x256xbf16>
    %25 = vector.shape_cast %24 : vector<1x1x256xbf16> to vector<1x256xbf16>
    %26 = vector.broadcast %25 : vector<1x256xbf16> to vector<8x256xbf16>
    %27 = arith.mulf %23, %26 : vector<8x256xbf16>
    %c1_15 = arith.constant 1 : index
    %c0_16 = arith.constant 0 : index
    %c0_17 = arith.constant 0 : index
    %28 = vector.load %arg4[%c1_15, %c0_16, %c0_17] : memref<9x8x8xbf16, #tpu.memory_space<vmem>>, vector<1x8x8xbf16>
    %29 = vector.shape_cast %28 : vector<1x8x8xbf16> to vector<8x8xbf16>
    %cst_18 = arith.constant dense<0.000000e+00> : vector<8x256xf32>
    %30 = tpu.matmul %29, %27, %cst_18 {dimension_numbers = #tpu.dot_dimension_numbers<[1], [0], [0], [1], [0, 0, 1, 1], [], []>} : vector<8x8xbf16>, vector<8x256xbf16>, vector<8x256xf32> -> vector<8x256xf32>
    %31 = arith.addf %20, %30 : vector<8x256xf32>
    %32 = vector.extract_strided_slice %10 {offsets = [0, 250], sizes = [8, 6], strides = [1, 1]} : vector<8x256xbf16> to vector<8x6xbf16>
    %33 = vector.extract_strided_slice %10 {offsets = [0, 0], sizes = [8, 250], strides = [1, 1]} : vector<8x256xbf16> to vector<8x250xbf16>
    %34 = tpu.concatenate %32, %33 in 1 : vector<8x6xbf16>, vector<8x250xbf16> -> vector<8x256xbf16>
    %c2 = arith.constant 2 : index
    %c0_19 = arith.constant 0 : index
    %c0_20 = arith.constant 0 : index
    %35 = vector.load %arg6[%c2, %c0_19, %c0_20] : memref<9x1x256xbf16, #tpu.memory_space<vmem>>, vector<1x1x256xbf16>
    %36 = vector.shape_cast %35 : vector<1x1x256xbf16> to vector<1x256xbf16>
    %37 = vector.broadcast %36 : vector<1x256xbf16> to vector<8x256xbf16>
    %38 = arith.mulf %34, %37 : vector<8x256xbf16>
    %c2_21 = arith.constant 2 : index
    %c0_22 = arith.constant 0 : index
    %c0_23 = arith.constant 0 : index
    %39 = vector.load %arg4[%c2_21, %c0_22, %c0_23] : memref<9x8x8xbf16, #tpu.memory_space<vmem>>, vector<1x8x8xbf16>
    %40 = vector.shape_cast %39 : vector<1x8x8xbf16> to vector<8x8xbf16>
    %cst_24 = arith.constant dense<0.000000e+00> : vector<8x256xf32>
    %41 = tpu.matmul %40, %38, %cst_24 {dimension_numbers = #tpu.dot_dimension_numbers<[1], [0], [0], [1], [0, 0, 1, 1], [], []>} : vector<8x8xbf16>, vector<8x256xbf16>, vector<8x256xf32> -> vector<8x256xf32>
    %42 = arith.addf %31, %41 : vector<8x256xf32>
    %43 = vector.extract_strided_slice %10 {offsets = [0, 255], sizes = [8, 1], strides = [1, 1]} : vector<8x256xbf16> to vector<8x1xbf16>
    %44 = vector.extract_strided_slice %10 {offsets = [0, 0], sizes = [8, 255], strides = [1, 1]} : vector<8x256xbf16> to vector<8x255xbf16>
    %45 = tpu.concatenate %43, %44 in 1 : vector<8x1xbf16>, vector<8x255xbf16> -> vector<8x256xbf16>
    %c3 = arith.constant 3 : index
    %c0_25 = arith.constant 0 : index
    %c0_26 = arith.constant 0 : index
    %46 = vector.load %arg6[%c3, %c0_25, %c0_26] : memref<9x1x256xbf16, #tpu.memory_space<vmem>>, vector<1x1x256xbf16>
    %47 = vector.shape_cast %46 : vector<1x1x256xbf16> to vector<1x256xbf16>
    %48 = vector.broadcast %47 : vector<1x256xbf16> to vector<8x256xbf16>
    %49 = arith.mulf %45, %48 : vector<8x256xbf16>
    %c3_27 = arith.constant 3 : index
    %c0_28 = arith.constant 0 : index
    %c0_29 = arith.constant 0 : index
    %50 = vector.load %arg4[%c3_27, %c0_28, %c0_29] : memref<9x8x8xbf16, #tpu.memory_space<vmem>>, vector<1x8x8xbf16>
    %51 = vector.shape_cast %50 : vector<1x8x8xbf16> to vector<8x8xbf16>
    %cst_30 = arith.constant dense<0.000000e+00> : vector<8x256xf32>
    %52 = tpu.matmul %51, %49, %cst_30 {dimension_numbers = #tpu.dot_dimension_numbers<[1], [0], [0], [1], [0, 0, 1, 1], [], []>} : vector<8x8xbf16>, vector<8x256xbf16>, vector<8x256xf32> -> vector<8x256xf32>
    %53 = arith.addf %42, %52 : vector<8x256xf32>
    %c4 = arith.constant 4 : index
    %c0_31 = arith.constant 0 : index
    %c0_32 = arith.constant 0 : index
    %54 = vector.load %arg6[%c4, %c0_31, %c0_32] : memref<9x1x256xbf16, #tpu.memory_space<vmem>>, vector<1x1x256xbf16>
    %55 = vector.shape_cast %54 : vector<1x1x256xbf16> to vector<1x256xbf16>
    %56 = vector.broadcast %55 : vector<1x256xbf16> to vector<8x256xbf16>
    %57 = arith.mulf %10, %56 : vector<8x256xbf16>
    %c4_33 = arith.constant 4 : index
    %c0_34 = arith.constant 0 : index
    %c0_35 = arith.constant 0 : index
    %58 = vector.load %arg4[%c4_33, %c0_34, %c0_35] : memref<9x8x8xbf16, #tpu.memory_space<vmem>>, vector<1x8x8xbf16>
    %59 = vector.shape_cast %58 : vector<1x8x8xbf16> to vector<8x8xbf16>
    %cst_36 = arith.constant dense<0.000000e+00> : vector<8x256xf32>
    %60 = tpu.matmul %59, %57, %cst_36 {dimension_numbers = #tpu.dot_dimension_numbers<[1], [0], [0], [1], [0, 0, 1, 1], [], []>} : vector<8x8xbf16>, vector<8x256xbf16>, vector<8x256xf32> -> vector<8x256xf32>
    %61 = arith.addf %53, %60 : vector<8x256xf32>
    %62 = vector.extract_strided_slice %10 {offsets = [0, 1], sizes = [8, 255], strides = [1, 1]} : vector<8x256xbf16> to vector<8x255xbf16>
    %63 = vector.extract_strided_slice %10 {offsets = [0, 0], sizes = [8, 1], strides = [1, 1]} : vector<8x256xbf16> to vector<8x1xbf16>
    %64 = tpu.concatenate %62, %63 in 1 : vector<8x255xbf16>, vector<8x1xbf16> -> vector<8x256xbf16>
    %c5 = arith.constant 5 : index
    %c0_37 = arith.constant 0 : index
    %c0_38 = arith.constant 0 : index
    %65 = vector.load %arg6[%c5, %c0_37, %c0_38] : memref<9x1x256xbf16, #tpu.memory_space<vmem>>, vector<1x1x256xbf16>
    %66 = vector.shape_cast %65 : vector<1x1x256xbf16> to vector<1x256xbf16>
    %67 = vector.broadcast %66 : vector<1x256xbf16> to vector<8x256xbf16>
    %68 = arith.mulf %64, %67 : vector<8x256xbf16>
    %c5_39 = arith.constant 5 : index
    %c0_40 = arith.constant 0 : index
    %c0_41 = arith.constant 0 : index
    %69 = vector.load %arg4[%c5_39, %c0_40, %c0_41] : memref<9x8x8xbf16, #tpu.memory_space<vmem>>, vector<1x8x8xbf16>
    %70 = vector.shape_cast %69 : vector<1x8x8xbf16> to vector<8x8xbf16>
    %cst_42 = arith.constant dense<0.000000e+00> : vector<8x256xf32>
    %71 = tpu.matmul %70, %68, %cst_42 {dimension_numbers = #tpu.dot_dimension_numbers<[1], [0], [0], [1], [0, 0, 1, 1], [], []>} : vector<8x8xbf16>, vector<8x256xbf16>, vector<8x256xf32> -> vector<8x256xf32>
    %72 = arith.addf %61, %71 : vector<8x256xf32>
    %73 = vector.extract_strided_slice %10 {offsets = [0, 6], sizes = [8, 250], strides = [1, 1]} : vector<8x256xbf16> to vector<8x250xbf16>
    %74 = vector.extract_strided_slice %10 {offsets = [0, 0], sizes = [8, 6], strides = [1, 1]} : vector<8x256xbf16> to vector<8x6xbf16>
    %75 = tpu.concatenate %73, %74 in 1 : vector<8x250xbf16>, vector<8x6xbf16> -> vector<8x256xbf16>
    %c6 = arith.constant 6 : index
    %c0_43 = arith.constant 0 : index
    %c0_44 = arith.constant 0 : index
    %76 = vector.load %arg6[%c6, %c0_43, %c0_44] : memref<9x1x256xbf16, #tpu.memory_space<vmem>>, vector<1x1x256xbf16>
    %77 = vector.shape_cast %76 : vector<1x1x256xbf16> to vector<1x256xbf16>
    %78 = vector.broadcast %77 : vector<1x256xbf16> to vector<8x256xbf16>
    %79 = arith.mulf %75, %78 : vector<8x256xbf16>
    %c6_45 = arith.constant 6 : index
    %c0_46 = arith.constant 0 : index
    %c0_47 = arith.constant 0 : index
    %80 = vector.load %arg4[%c6_45, %c0_46, %c0_47] : memref<9x8x8xbf16, #tpu.memory_space<vmem>>, vector<1x8x8xbf16>
    %81 = vector.shape_cast %80 : vector<1x8x8xbf16> to vector<8x8xbf16>
    %cst_48 = arith.constant dense<0.000000e+00> : vector<8x256xf32>
    %82 = tpu.matmul %81, %79, %cst_48 {dimension_numbers = #tpu.dot_dimension_numbers<[1], [0], [0], [1], [0, 0, 1, 1], [], []>} : vector<8x8xbf16>, vector<8x256xbf16>, vector<8x256xf32> -> vector<8x256xf32>
    %83 = arith.addf %72, %82 : vector<8x256xf32>
    %84 = vector.extract_strided_slice %10 {offsets = [0, 7], sizes = [8, 249], strides = [1, 1]} : vector<8x256xbf16> to vector<8x249xbf16>
    %85 = vector.extract_strided_slice %10 {offsets = [0, 0], sizes = [8, 7], strides = [1, 1]} : vector<8x256xbf16> to vector<8x7xbf16>
    %86 = tpu.concatenate %84, %85 in 1 : vector<8x249xbf16>, vector<8x7xbf16> -> vector<8x256xbf16>
    %c7 = arith.constant 7 : index
    %c0_49 = arith.constant 0 : index
    %c0_50 = arith.constant 0 : index
    %87 = vector.load %arg6[%c7, %c0_49, %c0_50] : memref<9x1x256xbf16, #tpu.memory_space<vmem>>, vector<1x1x256xbf16>
    %88 = vector.shape_cast %87 : vector<1x1x256xbf16> to vector<1x256xbf16>
    %89 = vector.broadcast %88 : vector<1x256xbf16> to vector<8x256xbf16>
    %90 = arith.mulf %86, %89 : vector<8x256xbf16>
    %c7_51 = arith.constant 7 : index
    %c0_52 = arith.constant 0 : index
    %c0_53 = arith.constant 0 : index
    %91 = vector.load %arg4[%c7_51, %c0_52, %c0_53] : memref<9x8x8xbf16, #tpu.memory_space<vmem>>, vector<1x8x8xbf16>
    %92 = vector.shape_cast %91 : vector<1x8x8xbf16> to vector<8x8xbf16>
    %cst_54 = arith.constant dense<0.000000e+00> : vector<8x256xf32>
    %93 = tpu.matmul %92, %90, %cst_54 {dimension_numbers = #tpu.dot_dimension_numbers<[1], [0], [0], [1], [0, 0, 1, 1], [], []>} : vector<8x8xbf16>, vector<8x256xbf16>, vector<8x256xf32> -> vector<8x256xf32>
    %94 = arith.addf %83, %93 : vector<8x256xf32>
    %95 = vector.extract_strided_slice %10 {offsets = [0, 8], sizes = [8, 248], strides = [1, 1]} : vector<8x256xbf16> to vector<8x248xbf16>
    %96 = vector.extract_strided_slice %10 {offsets = [0, 0], sizes = [8, 8], strides = [1, 1]} : vector<8x256xbf16> to vector<8x8xbf16>
    %97 = tpu.concatenate %95, %96 in 1 : vector<8x248xbf16>, vector<8x8xbf16> -> vector<8x256xbf16>
    %c8 = arith.constant 8 : index
    %c0_55 = arith.constant 0 : index
    %c0_56 = arith.constant 0 : index
    %98 = vector.load %arg6[%c8, %c0_55, %c0_56] : memref<9x1x256xbf16, #tpu.memory_space<vmem>>, vector<1x1x256xbf16>
    %99 = vector.shape_cast %98 : vector<1x1x256xbf16> to vector<1x256xbf16>
    %100 = vector.broadcast %99 : vector<1x256xbf16> to vector<8x256xbf16>
    %101 = arith.mulf %97, %100 : vector<8x256xbf16>
    %c8_57 = arith.constant 8 : index
    %c0_58 = arith.constant 0 : index
    %c0_59 = arith.constant 0 : index
    %102 = vector.load %arg4[%c8_57, %c0_58, %c0_59] : memref<9x8x8xbf16, #tpu.memory_space<vmem>>, vector<1x8x8xbf16>
    %103 = vector.shape_cast %102 : vector<1x8x8xbf16> to vector<8x8xbf16>
    %cst_60 = arith.constant dense<0.000000e+00> : vector<8x256xf32>
    %104 = tpu.matmul %103, %101, %cst_60 {dimension_numbers = #tpu.dot_dimension_numbers<[1], [0], [0], [1], [0, 0, 1, 1], [], []>} : vector<8x8xbf16>, vector<8x256xbf16>, vector<8x256xf32> -> vector<8x256xf32>
    %105 = arith.addf %94, %104 : vector<8x256xf32>
    %c0_61 = arith.constant 0 : index
    %c0_62 = arith.constant 0 : index
    %106 = vector.load %arg5[%c0_61, %c0_62] : memref<8x1xf32, #tpu.memory_space<vmem>>, vector<8x1xf32>
    %107 = vector.broadcast %106 : vector<8x1xf32> to vector<8x256xf32>
    %108 = arith.addf %105, %107 : vector<8x256xf32>
    %cst_63 = arith.constant 0.000000e+00 : f32
    %109 = vector.broadcast %cst_63 : f32 to vector<8x256xf32>
    %110 = arith.maximumf %108, %109 : vector<8x256xf32>
    %111 = arith.addf %110, %9 : vector<8x256xf32>
    %cst_64 = arith.constant 0.000000e+00 : f32
    %112 = vector.broadcast %cst_64 : f32 to vector<8x256xf32>
    %113 = arith.cmpf ogt, %111, %112 : vector<8x256xf32>
    %cst_65 = arith.constant 0.000000e+00 : f32
    %114 = vector.broadcast %cst_65 : f32 to vector<8x256xf32>
    %115 = arith.minimumf %111, %114 : vector<8x256xf32>
    %116 = math.exp %115 : vector<8x256xf32>
    %cst_66 = arith.constant 1.000000e+00 : f32
    %117 = vector.broadcast %cst_66 : f32 to vector<8x256xf32>
    %118 = arith.subf %116, %117 : vector<8x256xf32>
    %119 = arith.select %113, %111, %118 : vector<8x256xi1>, vector<8x256xf32>
    %c0_67 = arith.constant 0 : index
    %c0_68 = arith.constant 0 : index
    %120 = vector.load %arg7[%c0_67, %c0_68] : memref<8x256xf32, #tpu.memory_space<vmem>>, vector<8x256xf32>
    tpu.vector_store %arg7[%c0_67, %c0_68], %119 {strides = array<i32>} : memref<8x256xf32, #tpu.memory_space<vmem>>, vector<8x256xf32>,
    return
  }
  func.func @transform_0(%arg0: i32) -> (i32, i32) {
    %c0_i32 = arith.constant 0 : i32
    %c0_i32_0 = arith.constant 0 : i32
    return %c0_i32, %arg0 : i32, i32
  }
  func.func @transform_1(%arg0: i32) -> (i32, i32) {
    %c0_i32 = arith.constant 0 : i32
    %c0_i32_0 = arith.constant 0 : i32
    %c0_i32_1 = arith.constant 0 : i32
    return %c0_i32, %c0_i32_0 : i32, i32
  }
  func.func @transform_2(%arg0: i32) -> (i32, i32) {
    %c0_i32 = arith.constant 0 : i32
    %c0_i32_0 = arith.constant 0 : i32
    %c0_i32_1 = arith.constant 0 : i32
    return %c0_i32, %c0_i32_0 : i32, i32
  }
  func.func @transform_3(%arg0: i32) -> (i32, i32, i32) {
    %c0_i32 = arith.constant 0 : i32
    %c0_i32_0 = arith.constant 0 : i32
    %c0_i32_1 = arith.constant 0 : i32
    %c0_i32_2 = arith.constant 0 : i32
    return %c0_i32, %c0_i32_0, %c0_i32_1 : i32, i32, i32
  }
  func.func @transform_4(%arg0: i32) -> (i32, i32) {
    %c0_i32 = arith.constant 0 : i32
    %c0_i32_0 = arith.constant 0 : i32
    %c0_i32_1 = arith.constant 0 : i32
    return %c0_i32, %c0_i32_0 : i32, i32
  }
  func.func @transform_5(%arg0: i32) -> (i32, i32, i32) {
    %c0_i32 = arith.constant 0 : i32
    %c0_i32_0 = arith.constant 0 : i32
    %c0_i32_1 = arith.constant 0 : i32
    %c0_i32_2 = arith.constant 0 : i32
    return %c0_i32, %c0_i32_0, %c0_i32_1 : i32, i32, i32
  }
  func.func @transform_6(%arg0: i32) -> (i32, i32) {
    %c0_i32 = arith.constant 0 : i32
    %c0_i32_0 = arith.constant 0 : i32
    return %c0_i32, %arg0 : i32, i32
  }
}

</mosaic_0001>

<bundles_post_ra>
// kernel: block_forward.1
= control target key start
LH: loop header
LB: loop body
LE: loop exit
PB: predicated region body
PF: predicated region fallthrough
CT: control target
= control target key end

     0   :  { %vm77_vm0 = vcmask 1041408   ;;  %v1188_v1 = vmov 0   ;;  %vm73_vm1 = vcmask 293888   ;;  %s1191_s11 = smov 6   ;;  %s1192_s12 = smov 1   ;;  %v158_v24 = vlaneseq  ;;  %s1431_s0 = inlined_call_operand.vmem [shape: bf16[36,256], index: 0, kind: input, shape index: {}]   ;;  %s1432_s2 = inlined_call_operand.vmem [shape: f32[16,1], index: 2, kind: input, shape index: {}]   ;;  %s1433_s1 = inlined_call_operand.vmem [shape: bf16[16,36], index: 1, kind: input, shape index: {}]   ;;  %s1434_s4 = inlined_call_operand.vmem [shape: f32[8,1], index: 4, kind: input, shape index: {}]   ;;  %s1435_s5 = inlined_call_operand.vmem [shape: bf16[9,1,256], index: 5, kind: input, shape index: {}]   ;;  %s1436_s3 = inlined_call_operand.vmem [shape: bf16[9,8,8], index: 3, kind: input, shape index: {}]   ;;  %s1437_s6 = inlined_call_operand.vmem [shape: f32[8,256], index: 6, kind: output, shape index: {}]  }
   0x1   :  { %v28_v0 = vld [vmem:[%s1431_s0 + $0x20] sm:$0x33]  ;;  %116 = vmatprep.mubr.bf16.mxu0 %v1188_v1  ;;  %1173 = vset.pattern.permute.xlu0 %v1188_v1  ;;  %v1177_v4 = vld [vmem:[%s1431_s0 + $0x14] ss:$8 sps:$4 sm:$0xff]   ;;  %v1179_v6 = vld [vmem:[%s1431_s0 + $0x10] ss:$8 sps:$4 sm:$0xff]  }
   0x2   :  { %v1115_v2 = vcombine.high %v28_v0, %v28_v0  ;;  %v1114_v3 = vcombine.low %v28_v0, %v28_v0  ;;  %283 = vmatprep.mubr.bf16.mxu1 %v1188_v1  ;;  %1174 = vset.pattern.permute.xlu1 %v1188_v1  ;;  %v31_v7 = vld [vmem:[%s1432_s2] sm:$0xff]  ;;  %s1193_s13 = smov 127   ;;  %s1194_s14 = smov 122   ;;  %v32_v20 = vld [vmem:[%s1432_s2 + $0x8] sm:$0xff]  ;;  %v1197_v22 = vmov 1966171168  }
   0x3   :  { %v1180_v8 = vld [vmem:[%s1431_s0 + $0x4] ss:$8 sps:$4 sm:$0xff]   ;;  %35 = vperm.xlu0 %1173, %v31_v7   ;;  %v1182_v9 = vld [vmem:[%s1431_s0] ss:$8 sps:$4 sm:$0xff]   ;;  %s1189_s0 = smov 7   ;;  %s1195_s15 = smov 121   ;;  %v156_v23 = vunpack.c.l.s4 %v1197_v22 }
   0x4   :  { %1116 = vmatprep.subr.msk.bf16.mxu0 %vm77_vm0, %v1115_v2  ;;  %v79_v5 = vsel %vm77_vm0, %v1114_v3, 0  ;;  %v1183_v10 = vld [vmem:[%s1433_s1] sm:$0xff]   ;;  %s1190_s1 = smov 8   ;;  %s1196_s16 = smov 120   ;;  %v159_v27 = vshrl.u32 %v158_v24, 7  ;;  %vm190_vm2 = vcmask 56320  }
   0x5   :  { %95 = vmatpush1.bf16.msra.mxu0 %v79_v5  ;;  %v1079_v21 = vld [vmem:[%s1434_s4] sm:$0xff]  ;;  %v157_v26 = vunpack.c.0.s8 %v156_v23  ;;  %v1137_v37 = vld.sshfl [vmem:[%s1435_s5 + $0x8] sm:$0x11 pattern:$0x75316420]  ;;  %vm137_vm3 = vcmask 64512  }
   0x6   :  { %96 = vmatprep.subr.bf16.mxu0 %v1177_v4  ;;  %v1120_v25 = vld.sshfl [vmem:[%s1435_s5 + $0x2] sm:$0x11 pattern:$0x75316420]  ;;  %v566_v42 = vcombine.high %v1137_v37, %v1137_v37  ;;  %v1306_v44 = vsub.s32 0, %v159_v27  ;;  %vm244_vm4 = vcmask 1043456  }
   0x7   :  { %v1118_v28 = vld.sshfl [vmem:[%s1435_s5] sm:$0x11 pattern:$0x75316420]  ;;  %v208_v29 = vcombine.high %v1120_v25, %v1120_v25  ;;  %v1291_v31 = vsub.s32 %v157_v26, %v159_v27  ;;  %vm346_vm5 = vcmask 48128   ;;  %vm453_vm6 = vcmask 7168  }
   0x8   :  { %v154_v30 = vcombine.high %v1118_v28, %v1118_v28  ;;  %v1127_v34 = vld.sshfl [vmem:[%s1435_s5 + $0x4] sm:$0x11 pattern:$0x75316420]  ;;  %vm655_vm7 = vcmask 1039360   ;;  %vm762_vm8 = vcmask 998400  }
   0x9   :  { %97 = vmatpush1.bf16.msra.mxu0 %v1179_v6  ;;  %v222_v32 = vrot.slane %v208_v29, %v1291_v31  ;;  %v215_v33 = vrot.slane %v1120_v25, %v1291_v31  ;;  %v161_v35 = vrot.slane %v1118_v28, %v1291_v31  ;;  %v364_v38 = vcombine.high %v1127_v34, %v1127_v34  ;;  %v1132_v41 = vld.sshfl [vmem:[%s1435_s5 + $0x6] sm:$0x11 pattern:$0x75316420] }
   0xa   :  { %98 = vmatprep.subr.bf16.mxu0 %v1180_v8  ;;  %v168_v36 = vrot.slane %v154_v30, %v1291_v31  ;;  %v371_v46 = vrot.slane %v1127_v34, %v1291_v31  ;;  %v471_v51 = vcombine.high %v1132_v41, %v1132_v41  ;;  %v580_v52 = vrot.slane %v566_v42, %v1291_v31  ;;  %v1142_v53 = vld.sshfl [vmem:[%s1435_s5 + $0xa] sm:$0x11 pattern:$0x75316420] }
   0xb   :  { %v231_v39 = vpack.i.b16 %v222_v32, %v222_v32  ;;  %v224_v40 = vpack.i.b16 %v215_v33, %v215_v33  ;;  %v170_v43 = vpack.i.b16 %v161_v35, %v161_v35  ;;  %v378_v47 = vrot.slane %v364_v38, %v1291_v31  ;;  %v1147_v63 = vld.sshfl [vmem:[%s1435_s5 + $0xc] sm:$0x11 pattern:$0x75316420] }
   0xc   :  { %v177_v45 = vpack.i.b16 %v168_v36, %v168_v36  ;;  %v573_v54 = vrot.slane %v1137_v37, %v1291_v31  ;;  %v478_v58 = vrot.slane %v1132_v41, %v1291_v31  ;;  %v380_v61 = vpack.i.b16 %v371_v46, %v371_v46  ;;  %v1152_v24 = vld.sshfl [vmem:[%s1435_s5 + $0xe] sm:$0x11 pattern:$0x75316420] }
   0xd   :  { %99 = vmatpush1.bf16.msra.mxu0 %v1182_v9  ;;  %v236_v49 = vrot.slane %v231_v39, %v1306_v44  ;;  %v229_v50 = vrot.slane %v224_v40, %v1306_v44  ;;  %v175_v56 = vrot.slane %v170_v43, %v1306_v44  ;;  %v387_v62 = vpack.i.b16 %v378_v47, %v378_v47 }
   0xe   :  { %v182_v57 = vrot.slane %v177_v45, %v1306_v44  ;;  %v485_v4 = vrot.slane %v471_v51, %v1291_v31  ;;  %v673_v5 = vcombine.high %v1142_v53, %v1142_v53  ;;  %v589_v6 = vpack.i.b16 %v580_v52, %v580_v52  ;;  %v1157_v45 = vld.sshfl [vmem:[%s1435_s5 + $0x10] sm:$0x11 pattern:$0x75316420] }
   0xf   :  { %v582_v7 = vpack.i.b16 %v573_v54, %v573_v54  ;;  %v680_v26 = vrot.slane %v1142_v53, %v1291_v31  ;;  %v787_v32 = vrot.slane %v1147_v63, %v1291_v31  ;;  %v887_v36 = vcombine.high %v1152_v24, %v1152_v24  ;;  %v1128_v53 = vld [vmem:[%s1436_s3 + $0x8] sm:$0xf] }
  0x10   :  { %1117 = vmatmul.mubr.msk.bf16.vlgmr.msra.gmra.mxu0 %vm73_vm1, %v1183_v10  ;;  %v487_v10 = vpack.i.b16 %v478_v58, %v478_v58  ;;  %v494_v22 = vpack.i.b16 %v485_v4, %v485_v4  ;;  %v687_v23 = vrot.slane %v673_v5, %v1291_v31  ;;  %v594_v25 = vrot.slane %v589_v6, %v1306_v44 }
  0x11   :  { %438 = vmatprep.mubr.bf16.mxu0 %v1188_v1  ;;  %v587_v27 = vrot.slane %v582_v7, %v1306_v44  ;;  %v689_v42 = vpack.i.b16 %v680_v26, %v680_v26  ;;  %v901_v54 = vrot.slane %v887_v36, %v1291_v31  ;;  %v994_v58 = vcombine.high %v1157_v45, %v1157_v45 }
  0x12   :  { %v492_v30 = vrot.slane %v487_v10, %v1306_v44  ;;  %v499_v40 = vrot.slane %v494_v22, %v1306_v44  ;;  %v696_v41 = vpack.i.b16 %v687_v23, %v687_v23  ;;  %vm869_vm9 = vcmask 990208  }
  0x13   :  { %v910_v5 = vpack.i.b16 %v901_v54, %v901_v54  ;;  %vm976_vm10 = vcmask 982016  }
  0x7e   :  { %v36_v11 = vpop.permute.xlu0 %35 }
  0xd0   :  { %v118_v12 = vpop.f32.mrf.mxu0 }
  0xd1   :  { %v119_v13 = vadd.f32 %v118_v12, %v36_v11 }
  0xd2   :  { %v120_v14 = vpop.f32.mrf.mxu0 }
  0xd3   :  { %v127_v15 = vmax.f32 %v119_v13, 0.0  ;;  %v121_v16 = vadd.f32 %v120_v14, %v36_v11  ;;  %v780_v11 = vcombine.high %v1147_v63, %v1147_v63  ;;  %v385_v14 = vrot.slane %v380_v61, %v1306_v44 }
  0xd5   :  { %v1259_v17 = vpack.c.bf16 %v127_v15, %v127_v15  ;;  %v128_v18 = vmax.f32 %v121_v16, 0.0  ;;  %v392_v15 = vrot.slane %v387_v62, %v1306_v44  ;;  %v1121_v16 = vld [vmem:[%s1436_s3 + $0x4] sm:$0xf]  ;;  %v794_v33 = vrot.slane %v780_v11, %v1291_v31 }
  0xd7   :  { %v1261_v19 = vpack.c.bf16 %v128_v18, %v128_v18  ;;  %188 = vrot.lane.b32.xlu1 %v1259_v17, %s1189_s0  ;;  %v595_v43 = vmul.bf16 %v587_v27, %v1259_v17 }
  0xd9   :  { %186 = vrot.lane.b32.xlu0 %v1261_v19, %s1189_s0 }
  0xdb   :  { %132 = vrot.lane.b32.xlu1 %v1261_v19, %s1190_s1 }
  0xdd   :  { %135 = vrot.lane.b32.xlu0 %v1259_v17, %s1190_s1 }
  0xdf   :  { %342 = vrot.lane.b32.xlu1 %v1261_v19, %s1191_s11 }
  0xe1   :  { %344 = vrot.lane.b32.xlu0 %v1259_v17, %s1191_s11 }
  0xe3   :  { %449 = vrot.lane.b32.xlu1 %v1261_v19, %s1192_s12 }
  0xe5   :  { %451 = vrot.lane.b32.xlu0 %v1259_v17, %s1192_s12 }
  0xe7   :  { %651 = vrot.lane.b32.xlu1 %v1259_v17, %s1193_s13 }
  0xe9   :  { %653 = vrot.lane.b32.xlu0 %v1261_v19, %s1193_s13 }
  0xeb   :  { %758 = vrot.lane.b32.xlu1 %v1259_v17, %s1194_s14 }
  0xed   :  { %760 = vrot.lane.b32.xlu0 %v1261_v19, %s1194_s14 }
  0xef   :  { %865 = vrot.lane.b32.xlu1 %v1259_v17, %s1195_s15 }
  0xf1   :  { %867 = vrot.lane.b32.xlu0 %v1261_v19, %s1195_s15 }
  0xf3   :  { %972 = vrot.lane.b32.xlu1 %v1259_v17, %s1196_s16  ;;  %v185_v17 = vld [vmem:[%s1436_s3] sm:$0xf] }
  0xf5   :  { %974 = vrot.lane.b32.xlu0 %v1261_v19, %s1196_s16 }
  0xf7   :  { %1082 = vperm.xlu1 %1174, %v1079_v21  }
  0xf9   :  { %40 = vperm.xlu0 %1173, %v32_v20  }
 0x149   :  { %v189_v48 = vpop.permute.xlu1 %188 }
 0x14b   :  { %v187_v55 = vpop.permute.xlu0 %186 }
 0x14c   :  { %v191_v59 = vsel %vm190_vm2, %v189_v48, %v187_v55  ;;  %v196_v60 = vsel %vm190_vm2, %v187_v55, %v189_v48  ;;  %v596_v48 = vmul.bf16 %v594_v25, %v1261_v19 }
 0x14d   :  { %v133_v0 = vpop.permute.xlu1 %132  ;;  %v238_v2 = vmul.bf16 %v236_v49, %v191_v59  ;;  %v237_v3 = vmul.bf16 %v229_v50, %v196_v60  ;;  %v796_v49 = vpack.i.b16 %v787_v32, %v787_v32  ;;  %v803_v50 = vpack.i.b16 %v794_v33, %v794_v33 }
 0x14e   :  { %v694_v59 = vrot.slane %v689_v42, %v1306_v44  ;;  %v603_v60 = vsel %vm244_vm4, %v595_v43, 0 }
 0x14f   :  { %v136_v8 = vpop.permute.xlu0 %135  ;;  %1122 = vmatprep.subr.msk.bf16.mxu1 %vm244_vm4, %v238_v2  ;;  %v246_v9 = vsel %vm244_vm4, %v237_v3, 0  ;;  %v801_v63 = vrot.slane %v796_v49, %v1306_v44  ;;  %v894_v2 = vrot.slane %v1152_v24, %v1291_v31 }
 0x150   :  { %v138_v12 = vsel %vm137_vm3, %v136_v8, %v133_v0  ;;  %v143_v13 = vsel %vm137_vm3, %v133_v0, %v136_v8  ;;  %266 = vmatpush1.bf16.msra.mxu1 %v246_v9  ;;  %v808_v0 = vrot.slane %v803_v50, %v1306_v44  ;;  %v1001_v8 = vrot.slane %v1157_v45, %v1291_v31  ;;  %v1153_v45 = vld [vmem:[%s1436_s3 + $0x1c] sm:$0xf] }
 0x151   :  { %v183_v18 = vmul.bf16 %v175_v56, %v143_v13  ;;  %v184_v20 = vmul.bf16 %v182_v57, %v138_v12  ;;  %v343_v21 = vpop.permute.xlu1 %342  ;;  %v701_v57 = vrot.slane %v696_v41, %v1306_v44  ;;  %v1008_v9 = vrot.slane %v994_v58, %v1291_v31  ;;  %v1138_v31 = vld [vmem:[%s1436_s3 + $0x10] sm:$0xf] }
 0x152   :  { %v903_v12 = vpack.i.b16 %v894_v2, %v894_v2  ;;  %v1010_v22 = vpack.i.b16 %v1001_v8, %v1001_v8 }
 0x153   :  { %v345_v28 = vpop.permute.xlu0 %344  ;;  %1123 = vmatmul.mubr.msk.bf16.vlgmr.msra.gmra.mxu1 %vm137_vm3, %v1121_v16  ;;  %1124 = vmatprep.subr.msk.bf16.mxu1 %vm244_vm4, %v184_v20  ;;  %v296_v29 = vsel %vm244_vm4, %v183_v18, 0  ;;  %v1133_v16 = vld [vmem:[%s1436_s3 + $0xc] sm:$0xf]  ;;  %v1017_v23 = vpack.i.b16 %v1008_v9, %v1008_v9 }
 0x154   :  { %v347_v34 = vsel %vm346_vm5, %v345_v28, %v343_v21  ;;  %v352_v35 = vsel %vm346_vm5, %v343_v21, %v345_v28  ;;  %316 = vmatpush1.bf16.msra.mxu1 %v296_v29  ;;  %333 = vmatprep.mubr.bf16.mxu1 %v1188_v1  ;;  %v908_v24 = vrot.slane %v903_v12, %v1306_v44 }
 0x155   :  { %v393_v37 = vmul.bf16 %v385_v14, %v352_v35  ;;  %v394_v38 = vmul.bf16 %v392_v15, %v347_v34  ;;  %v450_v39 = vpop.permute.xlu1 %449  ;;  %v915_v15 = vrot.slane %v910_v5, %v1306_v44  ;;  %v1015_v32 = vrot.slane %v1010_v22, %v1306_v44 }
 0x156   :  { %v1022_v33 = vrot.slane %v1017_v23, %v1306_v44 }
 0x157   :  { %v452_v46 = vpop.permute.xlu0 %451  ;;  %1129 = vmatprep.subr.msk.bf16.mxu0 %vm244_vm4, %v394_v38  ;;  %v401_v47 = vsel %vm244_vm4, %v393_v37, 0 }
 0x158   :  { %v454_v51 = vsel %vm453_vm6, %v452_v46, %v450_v39  ;;  %v459_v52 = vsel %vm453_vm6, %v450_v39, %v452_v46  ;;  %421 = vmatpush1.bf16.msra.mxu0 %v401_v47  ;;  %v1143_v39 = vld [vmem:[%s1436_s3 + $0x14] sm:$0xf]  ;;  %v1158_v46 = vld [vmem:[%s1436_s3 + $0x20] sm:$0xf] }
 0x159   :  { %v500_v55 = vmul.bf16 %v492_v30, %v459_v52  ;;  %v501_v19 = vmul.bf16 %v499_v40, %v454_v51  ;;  %1139 = vmatprep.subr.msk.bf16.mxu0 %vm244_vm4, %v596_v48  ;;  %v652_v56 = vpop.permute.xlu1 %651  ;;  %v1148_v40 = vld [vmem:[%s1436_s3 + $0x18] sm:$0xf]  ;;  %v122_v48 = vpop.f32.mrf.mxu0 }
 0x15b   :  { %v654_v61 = vpop.permute.xlu0 %653  ;;  %1125 = vmatmul.mubr.msk.bf16.vlgmr.msra.gmra.mxu1 %vm137_vm3, %v185_v17  ;;  %1130 = vmatmul.mubr.msk.bf16.vlgmr.msra.gmra.mxu0 %vm137_vm3, %v1128_v53  ;;  %v508_v62 = vsel %vm244_vm4, %v500_v55, 0  ;;  %v124_v51 = vpop.f32.mrf.mxu0 }
 0x15c   :  { %v656_v3 = vsel %vm655_vm7, %v652_v56, %v654_v61  ;;  %v661_v4 = vsel %vm655_vm7, %v654_v61, %v652_v56  ;;  %1134 = vmatprep.subr.msk.bf16.mxu1 %vm244_vm4, %v501_v19  ;;  %623 = vmatpush1.bf16.msra.mxu0 %v603_v60 }
 0x15d   :  { %v703_v6 = vmul.bf16 %v701_v57, %v661_v4  ;;  %528 = vmatpush1.bf16.msra.mxu1 %v508_v62  ;;  %v759_v7 = vpop.permute.xlu1 %758  ;;  %545 = vmatprep.mubr.bf16.mxu1 %v1188_v1  ;;  %v702_v10 = vmul.bf16 %v694_v59, %v656_v3 }
 0x15e   :  { %640 = vmatprep.mubr.bf16.mxu0 %v1188_v1 }
 0x15f   :  { %v761_v11 = vpop.permute.xlu0 %760  ;;  %1144 = vmatprep.subr.msk.bf16.mxu1 %vm244_vm4, %v703_v6  ;;  %v710_v26 = vsel %vm244_vm4, %v702_v10, 0 }
 0x160   :  { %v763_v13 = vsel %vm762_vm8, %v759_v7, %v761_v11  ;;  %v768_v14 = vsel %vm762_vm8, %v761_v11, %v759_v7 }
 0x161   :  { %v809_v18 = vmul.bf16 %v801_v63, %v763_v13  ;;  %v810_v20 = vmul.bf16 %v808_v0, %v768_v14  ;;  %v866_v21 = vpop.permute.xlu1 %865 }
 0x163   :  { %v868_v25 = vpop.permute.xlu0 %867  ;;  %1135 = vmatmul.mubr.msk.bf16.vlgmr.msra.gmra.mxu1 %vm137_vm3, %v1133_v16  ;;  %1140 = vmatmul.mubr.msk.bf16.vlgmr.msra.gmra.mxu0 %vm137_vm3, %v1138_v31  ;;  %v817_v27 = vsel %vm244_vm4, %v809_v18, 0 }
 0x164   :  { %v870_v28 = vsel %vm869_vm9, %v866_v21, %v868_v25  ;;  %v875_v29 = vsel %vm869_vm9, %v868_v25, %v866_v21  ;;  %730 = vmatpush1.bf16.msra.mxu1 %v710_v26  ;;  %1149 = vmatprep.subr.msk.bf16.mxu0 %vm244_vm4, %v810_v20 }
 0x165   :  { %v917_v30 = vmul.bf16 %v915_v15, %v875_v29  ;;  %837 = vmatpush1.bf16.msra.mxu0 %v817_v27  ;;  %747 = vmatprep.mubr.bf16.mxu1 %v1188_v1  ;;  %v916_v34 = vmul.bf16 %v908_v24, %v870_v28  ;;  %v973_v35 = vpop.permute.xlu1 %972 }
 0x166   :  { %854 = vmatprep.mubr.bf16.mxu0 %v1188_v1 }
 0x167   :  { %v975_v36 = vpop.permute.xlu0 %974  ;;  %1154 = vmatprep.subr.msk.bf16.mxu1 %vm244_vm4, %v917_v30  ;;  %v924_v42 = vsel %vm244_vm4, %v916_v34, 0 }
 0x168   :  { %v977_v37 = vsel %vm976_vm10, %v973_v35, %v975_v36  ;;  %v982_v38 = vsel %vm976_vm10, %v975_v36, %v973_v35 }
 0x169   :  { %v1023_v44 = vmul.bf16 %v1015_v32, %v977_v37  ;;  %v1024_v41 = vmul.bf16 %v1022_v33, %v982_v38 }
 0x16b   :  { %1145 = vmatmul.mubr.msk.bf16.vlgmr.msra.gmra.mxu1 %vm137_vm3, %v1143_v39  ;;  %1150 = vmatmul.mubr.msk.bf16.vlgmr.msra.gmra.mxu0 %vm137_vm3, %v1148_v40  ;;  %v1031_v43 = vsel %vm244_vm4, %v1023_v44, 0 }
 0x16c   :  { %944 = vmatpush1.bf16.msra.mxu1 %v924_v42  ;;  %1159 = vmatprep.subr.msk.bf16.mxu0 %vm244_vm4, %v1024_v41 }
 0x16d   :  { %1051 = vmatpush1.bf16.msra.mxu0 %v1031_v43  ;;  %961 = vmatprep.mubr.bf16.mxu1 %v1188_v1 }
 0x16e   :  { %1068 = vmatprep.mubr.bf16.mxu0 %v1188_v1 }
 0x172   :  { %v1083_v27 = vpop.permute.xlu1 %1082 }
 0x173   :  { %1155 = vmatmul.mubr.msk.bf16.vlgmr.msra.gmra.mxu1 %vm137_vm3, %v1153_v45  ;;  %1160 = vmatmul.mubr.msk.bf16.vlgmr.msra.gmra.mxu0 %vm137_vm3, %v1158_v46 }
 0x174   :  { %v41_v30 = vpop.permute.xlu0 %40 }
 0x175   :  { %v123_v40 = vadd.f32 %v122_v48, %v41_v30  ;;  %v125_v42 = vadd.f32 %v124_v51, %v41_v30 }
 0x213   :  { %v285_v47 = vpop.f32.mrf.mxu1 }
 0x215   :  { %v287_v49 = vpop.f32.mrf.mxu1 }
 0x217   :  { %v289_v50 = vpop.f32.mrf.mxu1 }
 0x219   :  { %v290_v52 = vpop.f32.mrf.mxu1 }
 0x21b   :  { %v335_v17 = vpop.f32.mrf.mxu1  ;;  %v440_v1 = vpop.f32.mrf.mxu0 }
 0x21c   :  { %v336_v58 = vadd.f32 %v335_v17, %v285_v47 }
 0x21d   :  { %v337_v53 = vpop.f32.mrf.mxu1  ;;  %v442_v54 = vpop.f32.mrf.mxu0 }
 0x21e   :  { %v338_v61 = vadd.f32 %v337_v53, %v287_v49  ;;  %v447_v0 = vadd.f32 %v440_v1, %v336_v58 }
 0x21f   :  { %v339_v55 = vpop.f32.mrf.mxu1  ;;  %v444_v19 = vpop.f32.mrf.mxu0 }
 0x220   :  { %v448_v4 = vadd.f32 %v442_v54, %v338_v61 }
 0x221   :  { %v340_v56 = vpop.f32.mrf.mxu1  ;;  %v445_v57 = vpop.f32.mrf.mxu0 }
 0x223   :  { %v547_v59 = vpop.f32.mrf.mxu1  ;;  %v642_v60 = vpop.f32.mrf.mxu0 }
 0x224   :  { %v554_v5 = vadd.f32 %v547_v59, %v447_v0 }
 0x225   :  { %v549_v62 = vpop.f32.mrf.mxu1  ;;  %v644_v63 = vpop.f32.mrf.mxu0 }
 0x226   :  { %v555_v8 = vadd.f32 %v549_v62, %v448_v4  ;;  %v649_v11 = vadd.f32 %v642_v60, %v554_v5 }
 0x227   :  { %v551_v2 = vpop.f32.mrf.mxu1  ;;  %v646_v3 = vpop.f32.mrf.mxu0 }
 0x228   :  { %v650_v14 = vadd.f32 %v644_v63, %v555_v8 }
 0x229   :  { %v552_v6 = vpop.f32.mrf.mxu1  ;;  %v647_v7 = vpop.f32.mrf.mxu0 }
 0x22b   :  { %v749_v9 = vpop.f32.mrf.mxu1  ;;  %v856_v10 = vpop.f32.mrf.mxu0 }
 0x22c   :  { %v756_v15 = vadd.f32 %v749_v9, %v649_v11 }
 0x22d   :  { %v751_v12 = vpop.f32.mrf.mxu1  ;;  %v858_v13 = vpop.f32.mrf.mxu0 }
 0x22e   :  { %v757_v18 = vadd.f32 %v751_v12, %v650_v14  ;;  %v863_v22 = vadd.f32 %v856_v10, %v756_v15 }
 0x22f   :  { %v753_v16 = vpop.f32.mrf.mxu1  ;;  %v860_v31 = vpop.f32.mrf.mxu0 }
 0x230   :  { %v864_v25 = vadd.f32 %v858_v13, %v757_v18 }
 0x231   :  { %v754_v20 = vpop.f32.mrf.mxu1  ;;  %v861_v21 = vpop.f32.mrf.mxu0 }
 0x233   :  { %v963_v23 = vpop.f32.mrf.mxu1  ;;  %v1070_v24 = vpop.f32.mrf.mxu0 }
 0x234   :  { %v970_v26 = vadd.f32 %v963_v23, %v863_v22 }
 0x235   :  { %v965_v28 = vpop.f32.mrf.mxu1  ;;  %v1072_v29 = vpop.f32.mrf.mxu0 }
 0x236   :  { %v1077_v32 = vadd.f32 %v1070_v24, %v970_v26  ;;  %v971_v33 = vadd.f32 %v965_v28, %v864_v25 }
 0x237   :  { %v967_v34 = vpop.f32.mrf.mxu1  ;;  %v1074_v35 = vpop.f32.mrf.mxu0 }
 0x238   :  { %v1078_v36 = vadd.f32 %v1072_v29, %v971_v33  ;;  %v1085_v37 = vadd.f32 %v1083_v27, %v1077_v32 }
 0x239   :  { %v968_v38 = vpop.f32.mrf.mxu1  ;;  %v1075_v39 = vpop.f32.mrf.mxu0 }
 0x23a   :  { %v1086_v44 = vadd.f32 %v1083_v27, %v1078_v36  ;;  %v1087_v41 = vmax.f32 %v1085_v37, 0.0 }
 0x23c   :  { %v1088_v43 = vmax.f32 %v1086_v44, 0.0  ;;  %v1089_v45 = vadd.f32 %v1087_v41, %v123_v40 }
 0x23e   :  { %v1090_v46 = vadd.f32 %v1088_v43, %v125_v42  ;;  %v1093_v47 = vmin.f32 %v1089_v45, 0.0  ;;  %vm1091_vm11 = vcmp.gt.f32.partialorder %v1089_v45, 0.0 }
 0x240   :  { %v1094_v49 = vmin.f32 %v1090_v46, 0.0  ;;  %v1095_v50 = vmul.f32 1.442695, %v1093_v47  ;;  %vm1092_vm12 = vcmp.gt.f32.partialorder %v1090_v46, 0.0 }
 0x242   :  { %1184 = vpow2.f32 %v1095_v50  ;;  %v1097_v52 = vmul.f32 1.442695, %v1094_v49 }
 0x244   :  { %1186 = vpow2.f32 %v1097_v52 }
 0x24f   :  { %v1185_v17 = vpop.eup %1184 }
 0x250   :  { %v1161_v1 = vadd.f32 -1.0, %v1185_v17 }
 0x251   :  { %v1187_v53 = vpop.eup %1186 }
 0x252   :  { %v1162_v54 = vadd.f32 -1.0, %v1187_v53  ;;  %v1101_v55 = vsel %vm1091_vm11, %v1089_v45, %v1161_v1 }
 0x253   :  { %1103 = vst [vmem:[%s1437_s6] sm:$0xff] %v1101_v55 }
 0x254   :  { %v1102_v48 = vsel %vm1092_vm12, %v1090_v46, %v1162_v54 }
 0x255   :  { %1104 = vst [vmem:[%s1437_s6 + $0x8] sm:$0xff] %v1102_v48 }

</bundles_post_ra>
